<compile_context>
chip_gen: v7x
topology: tpu7x:2x2x1
jax: 0.10.0
libtpu: 0.0.40
codegen_flags: <defaults>
</compile_context>

<pallas_src>
import functools

import jax
import jax.numpy as jnp
from jax import lax
from jax.experimental import pallas as pl
from jax.experimental.pallas import tpu as pltpu

LEAKY_SLOPE = 0.01   # torch.nn.LeakyReLU default negative_slope
BN_EPS = 1e-5        # torch.nn.BatchNorm1d default eps


def _round_up(x, m):
    return (x + m - 1) // m * m


def _pick_tile_rows(n, f):
    """Rows per tile: multiple of 8, sized so one f32 tile stays <= ~2 MiB so the
    double-buffered x/h/y tiles + resident weight fit v7x's 64 MiB VMEM with margin."""
    max_rows = max(8, (2 * 1024 * 1024) // (4 * f))
    max_rows = max(8, (max_rows // 8) * 8)
    return min(max_rows, _round_up(n, 8), 1024)


def _keep_bits(shape, row0, n_cols, seed):
    """Counter-based uint32 hash (splitmix32-style finalizer) of the global element
    index.  Pure jnp ops -> lowers on real TPU and in interpret mode."""
    rows = lax.broadcasted_iota(jnp.int32, shape, 0) + row0
    cols = lax.broadcasted_iota(jnp.int32, shape, 1)
    z = (rows * jnp.int32(n_cols) + cols).astype(jnp.uint32)
    z = z + jnp.uint32((int(seed) * 0x9E3779B9) & 0xFFFFFFFF)
    z = (z ^ (z >> 16)) * jnp.uint32(0x85EBCA6B)
    z = (z ^ (z >> 13)) * jnp.uint32(0xC2B2AE35)
    z = z ^ (z >> 16)
    return z


def _fuse_kernel(x_ref, w_ref, b_ref, h_ref, stats_ref, *,
                 tile_rows, n_valid, n_features, dropout_rate, seed):
    row0 = pl.program_id(0) * tile_rows

    x = x_ref[...]                                            # (tile, F) f32
    # Linear: x @ W^T  (torch (out, in) weight layout; contract dim-1 with dim-1 on MXU)
    z = lax.dot_general(x, w_ref[...],
                        dimension_numbers=(((1,), (1,)), ((), ())),
                        preferred_element_type=jnp.float32) + b_ref[...]
    # LeakyReLU + skip connection
    h = x + jnp.where(z >= 0.0, z, LEAKY_SLOPE * z)

    # Dropout (training mode, inverted scaling): integer-threshold compare on raw bits.
    if dropout_rate > 0.0:
        thresh = min(int(round(dropout_rate * 2.0 ** 32)), 2 ** 32 - 1)
        keep = _keep_bits(h.shape, row0, n_features, seed) >= jnp.uint32(thresh)
        h = jnp.where(keep, h * jnp.float32(1.0 / (1.0 - dropout_rate)), 0.0)

    h_ref[...] = h

    # Per-tile partial BatchNorm statistics over valid (non-padded) rows.
    rows = lax.broadcasted_iota(jnp.int32, h.shape, 0) + row0
    hm = jnp.where(rows < n_valid, h, 0.0)
    s = jnp.sum(hm, axis=0, keepdims=True)                    # (1, F)
    ss = jnp.sum(hm * hm, axis=0, keepdims=True)              # (1, F)
    stats_ref[...] = jnp.concatenate([s, ss], axis=0)[None, :, :]   # (1, 2, F)


def _bn_apply_kernel(h_ref, scale_ref, shift_ref, o_ref):
    o_ref[...] = h_ref[...] * scale_ref[...] + shift_ref[...]


def linear_skip_block(x, weight, bias, gamma, beta, *, dropout_rate=0.0, seed=0):
    """x: (N, F); weight: (F, F) torch layout (out, in); bias/gamma/beta: (F,)."""
    x = jnp.asarray(x, jnp.float32)
    w = jnp.asarray(weight, jnp.float32)
    n, f = x.shape

    tile = _pick_tile_rows(n, f)
    n_pad = _round_up(n, tile)
    num_tiles = n_pad // tile
    if n_pad != n:
        x = jnp.pad(x, ((0, n_pad - n), (0, 0)))

    b2 = jnp.asarray(bias, jnp.float32).reshape(1, f)
    g1 = jnp.asarray(gamma, jnp.float32)
    be1 = jnp.asarray(beta, jnp.float32)

    cparams = pltpu.CompilerParams(
        dimension_semantics=("parallel",),          # batch tiles split across TCs (v7x)
        vmem_limit_bytes=48 * 1024 * 1024,          # fits v7x's 64 MiB VMEM with margin
    )

    kern_a = functools.partial(
        _fuse_kernel, tile_rows=tile, n_valid=n, n_features=f,
        dropout_rate=float(dropout_rate), seed=int(seed))

    # ---- pass 1: fused Linear + LeakyReLU + skip + dropout, per-tile BN partials ----
    h_full, stats = pl.pallas_call(
        kern_a,
        grid=(num_tiles,),
        in_specs=[
            pl.BlockSpec((tile, f), lambda i: (i, 0)),     # x tile (streamed)
            pl.BlockSpec((f, f), lambda i: (0, 0)),        # weight (VMEM-resident)
            pl.BlockSpec((1, f), lambda i: (0, 0)),        # bias   (VMEM-resident)
        ],
        out_specs=[
            pl.BlockSpec((tile, f), lambda i: (i, 0)),     # h tile
            pl.BlockSpec((1, 2, f), lambda i: (i, 0, 0)),  # per-tile [sum, sumsq]
        ],
        out_shape=[
            jax.ShapeDtypeStruct((n_pad, f), jnp.float32),
            jax.ShapeDtypeStruct((num_tiles, 2, f), jnp.float32),
        ],
        compiler_params=cparams,
        cost_estimate=pl.CostEstimate(
            flops=2 * n_pad * f * f + 10 * n_pad * f,
            transcendentals=0,
            bytes_accessed=(2 * n_pad * f + f * f + 3 * f) * 4,
        ),
    )(x, w, b2)

    # ---- tiny O(F) cross-tile reduction (plain XLA) -> BN scale / shift ----
    sums = jnp.sum(stats, axis=0)                       # (2, F)
    mean = sums[0] / n
    var = jnp.maximum(sums[1] / n - mean * mean, 0.0)   # biased variance (training BN)
    inv = g1 * lax.rsqrt(var + BN_EPS)
    scale = inv.reshape(1, f)
    shift = (be1 - mean * inv).reshape(1, f)

    # ---- pass 2: apply batch-norm affine ----
    y_full = pl.pallas_call(
        _bn_apply_kernel,
        grid=(num_tiles,),
        in_specs=[
            pl.BlockSpec((tile, f), lambda i: (i, 0)),
            pl.BlockSpec((1, f), lambda i: (0, 0)),
            pl.BlockSpec((1, f), lambda i: (0, 0)),
        ],
        out_specs=pl.BlockSpec((tile, f), lambda i: (i, 0)),
        out_shape=jax.ShapeDtypeStruct((n_pad, f), jnp.float32),
        compiler_params=cparams,
        cost_estimate=pl.CostEstimate(
            flops=2 * n_pad * f,
            transcendentals=0,
            bytes_accessed=(2 * n_pad * f + 2 * f) * 4,
        ),
    )(h_full, scale, shift)

    return y_full[:n] if n_pad != n else y_full


def _reference_no_dropout(x, weight, bias, gamma, beta):
    h = jnp.dot(x, weight.T, precision=lax.Precision.HIGHEST) + bias
    h = jnp.where(h >= 0, h, LEAKY_SLOPE * h)
    h = x + h
    mean = jnp.mean(h, axis=0, keepdims=True)
    var = jnp.mean((h - mean) ** 2, axis=0, keepdims=True)
    return (h - mean) / jnp.sqrt(var + BN_EPS) * gamma + beta


if __name__ == "__main__":
    n_input = 32     # feature dim of the block
    batch = 8
    dropout_rate = 0.25

    key = jax.random.PRNGKey(0)
    kx, kw, kb = jax.random.split(key, 3)

    # nn.Linear-style uniform(-1/sqrt(F), 1/sqrt(F)) init; BN affine init (1, 0).
    bound = 1.0 / (n_input ** 0.5)
    weight = jax.random.uniform(kw, (n_input, n_input), jnp.float32, -bound, bound)
    bias = jax.random.uniform(kb, (n_input,), jnp.float32, -bound, bound)
    gamma = jnp.ones((n_input,), jnp.float32)
    beta = jnp.zeros((n_input,), jnp.float32)

    x = jax.random.normal(kx, (batch, n_input), jnp.float32)

    # Deterministic path check (dropout disabled).
    y0 = jax.block_until_ready(
        linear_skip_block(x, weight, bias, gamma, beta, dropout_rate=0.0))
    ref = _reference_no_dropout(x, weight, bias, gamma, beta)
    assert jnp.allclose(y0, ref, atol=1e-3, rtol=1e-3), "mismatch vs reference"

    # Training-mode run with dropout active.
    y1 = jax.block_until_ready(
        linear_skip_block(x, weight, bias, gamma, beta,
                          dropout_rate=dropout_rate, seed=1234))
    assert bool(jnp.all(jnp.isfinite(y1)))

    print("KERNEL_OK")
</pallas_src>

<mosaic_0001>
module attributes {stable_mosaic.version = 11 : i64} {
  func.func @_fuse_kernel(%arg0: i32, %arg1: memref<8x32xf32, #tpu.memory_space<vmem>>, %arg2: memref<32x32xf32, #tpu.memory_space<vmem>>, %arg3: memref<1x32xf32, #tpu.memory_space<vmem>>, %arg4: memref<8x32xf32, #tpu.memory_space<vmem>>, %arg5: memref<1x2x32xf32, #tpu.memory_space<vmem>>) attributes {dimension_semantics = [#tpu.dimension_semantics<parallel>], iteration_bounds = array<i64: 1>, scalar_prefetch = 0 : i64, scratch_operands = 0 : i64, tpu.core_type = #tpu.core_type<tc>, window_params = [{transform_indices = @transform_0, window_bounds = array<i64: 8, 32>}, {pipeline_mode = #tpu.pipeline_mode<synchronous>, transform_indices = @transform_1, window_bounds = array<i64: 32, 32>}, {pipeline_mode = #tpu.pipeline_mode<synchronous>, transform_indices = @transform_2, window_bounds = array<i64: 1, 32>}, {transform_indices = @transform_3, window_bounds = array<i64: 8, 32>}, {transform_indices = @transform_4, window_bounds = array<i64: 1, 2, 32>}]} {
    %c8_i32 = arith.constant 8 : i32
    %0 = arith.muli %arg0, %c8_i32 : i32
    %c0 = arith.constant 0 : index
    %c0_0 = arith.constant 0 : index
    %1 = vector.load %arg1[%c0, %c0_0] : memref<8x32xf32, #tpu.memory_space<vmem>>, vector<8x32xf32>
    %c0_1 = arith.constant 0 : index
    %c0_2 = arith.constant 0 : index
    %2 = vector.load %arg2[%c0_1, %c0_2] : memref<32x32xf32, #tpu.memory_space<vmem>>, vector<32x32xf32>
    %cst = arith.constant dense<0.000000e+00> : vector<8x32xf32>
    %3 = tpu.matmul %1, %2, %cst {dimension_numbers = #tpu.dot_dimension_numbers<[1], [1], [0], [0], [0, 0, 1, 0], [], []>} : vector<8x32xf32>, vector<32x32xf32>, vector<8x32xf32> -> vector<8x32xf32>
    %c0_3 = arith.constant 0 : index
    %c0_4 = arith.constant 0 : index
    %4 = vector.load %arg3[%c0_3, %c0_4] : memref<1x32xf32, #tpu.memory_space<vmem>>, vector<1x32xf32>
    %5 = vector.broadcast %4 : vector<1x32xf32> to vector<8x32xf32>
    %6 = arith.addf %3, %5 : vector<8x32xf32>
    %cst_5 = arith.constant 0.000000e+00 : f32
    %7 = vector.broadcast %cst_5 : f32 to vector<8x32xf32>
    %8 = arith.cmpf oge, %6, %7 : vector<8x32xf32>
    %cst_6 = arith.constant 0.00999999977 : f32
    %9 = vector.broadcast %cst_6 : f32 to vector<8x32xf32>
    %10 = arith.mulf %9, %6 : vector<8x32xf32>
    %11 = arith.select %8, %6, %10 : vector<8x32xi1>, vector<8x32xf32>
    %12 = arith.addf %1, %11 : vector<8x32xf32>
    %c0_7 = arith.constant 0 : index
    %c0_8 = arith.constant 0 : index
    %13 = vector.load %arg4[%c0_7, %c0_8] : memref<8x32xf32, #tpu.memory_space<vmem>>, vector<8x32xf32>
    tpu.vector_store %arg4[%c0_7, %c0_8], %12 {strides = array<i32>} : memref<8x32xf32, #tpu.memory_space<vmem>>, vector<8x32xf32>,
    %14 = tpu.iota {dimensions = array<i32: 0>} : vector<8x32xi32>
    %15 = vector.broadcast %0 : i32 to vector<8x32xi32>
    %16 = arith.addi %14, %15 : vector<8x32xi32>
    %c8_i32_9 = arith.constant 8 : i32
    %17 = vector.broadcast %c8_i32_9 : i32 to vector<8x32xi32>
    %18 = arith.cmpi slt, %16, %17 : vector<8x32xi32>
    %cst_10 = arith.constant 0.000000e+00 : f32
    %19 = vector.broadcast %cst_10 : f32 to vector<8x32xf32>
    %20 = arith.select %18, %12, %19 : vector<8x32xi1>, vector<8x32xf32>
    %cst_11 = arith.constant dense<0.000000e+00> : vector<32xf32>
    %21 = vector.multi_reduction <add>, %20, %cst_11 [0] : vector<8x32xf32> to vector<32xf32>
    %22 = vector.shape_cast %21 : vector<32xf32> to vector<1x32xf32>
    %23 = arith.mulf %20, %20 : vector<8x32xf32>
    %cst_12 = arith.constant dense<0.000000e+00> : vector<32xf32>
    %24 = vector.multi_reduction <add>, %23, %cst_12 [0] : vector<8x32xf32> to vector<32xf32>
    %25 = vector.shape_cast %24 : vector<32xf32> to vector<1x32xf32>
    %26 = tpu.concatenate %22, %25 in 0 : vector<1x32xf32>, vector<1x32xf32> -> vector<2x32xf32>
    %27 = vector.shape_cast %26 : vector<2x32xf32> to vector<1x2x32xf32>
    %c0_13 = arith.constant 0 : index
    %c0_14 = arith.constant 0 : index
    %c0_15 = arith.constant 0 : index
    %28 = vector.load %arg5[%c0_13, %c0_14, %c0_15] : memref<1x2x32xf32, #tpu.memory_space<vmem>>, vector<1x2x32xf32>
    tpu.vector_store %arg5[%c0_13, %c0_14, %c0_15], %27 {strides = array<i32>} : memref<1x2x32xf32, #tpu.memory_space<vmem>>, vector<1x2x32xf32>,
    return
  }
  func.func @transform_0(%arg0: i32) -> (i32, i32) {
    %c0_i32 = arith.constant 0 : i32
    %c0_i32_0 = arith.constant 0 : i32
    return %arg0, %c0_i32 : i32, i32
  }
  func.func @transform_1(%arg0: i32) -> (i32, i32) {
    %c0_i32 = arith.constant 0 : i32
    %c0_i32_0 = arith.constant 0 : i32
    %c0_i32_1 = arith.constant 0 : i32
    return %c0_i32, %c0_i32_0 : i32, i32
  }
  func.func @transform_2(%arg0: i32) -> (i32, i32) {
    %c0_i32 = arith.constant 0 : i32
    %c0_i32_0 = arith.constant 0 : i32
    %c0_i32_1 = arith.constant 0 : i32
    return %c0_i32, %c0_i32_0 : i32, i32
  }
  func.func @transform_3(%arg0: i32) -> (i32, i32) {
    %c0_i32 = arith.constant 0 : i32
    %c0_i32_0 = arith.constant 0 : i32
    return %arg0, %c0_i32 : i32, i32
  }
  func.func @transform_4(%arg0: i32) -> (i32, i32, i32) {
    %c0_i32 = arith.constant 0 : i32
    %c0_i32_0 = arith.constant 0 : i32
    %c0_i32_1 = arith.constant 0 : i32
    return %arg0, %c0_i32, %c0_i32_0 : i32, i32, i32
  }
}

</mosaic_0001>

<bundles_post_ra>
// kernel: tpu_custom_call.1
= control target key start
LH: loop header
LB: loop body
LE: loop exit
PB: predicated region body
PF: predicated region fallthrough
CT: control target
= control target key end

     0   :  { %10 = vsyncpa [#allocation3], 0  ;;  %s436_s0 = inlined_call_operand.hbm [shape: f32[8,32], index: 0, kind: input, shape index: {}]   ;;  %s437_s1 = inlined_call_operand.hbm [shape: f32[32,32], index: 1, kind: input, shape index: {}]   ;;  %s438_s2 = inlined_call_operand.vmem [shape: f32[1,32], index: 2, kind: input, shape index: {}]   ;;  %s439_s3 = inlined_call_operand.hbm [shape: f32[8,32], index: 3, kind: output, shape index: {0}]   ;;  %s440_s4 = inlined_call_operand.hbm [shape: f32[1,2,32], index: 4, kind: output, shape index: {1}]  }
   0x1   :  { %11 = vsyncpa [#allocation6], 0 }
   0x2   :  { %12 = vsyncpa [#allocation4], 0 }
   0x3   :  { %13 = vsyncpa [#allocation9], 0  ;;  %s338_s15 = smov [#allocation2]   ;;  %s339_s17 = smov [#allocation5]  }
   0x4   :  { %s20_s16 = sshll.u32 %s338_s15, 4  ;;  %s29_s18 = sshll.u32 %s339_s17, 4  ;;  %s21_s16 = int_to_ptr.vmem [resolvable:$true] %s20_s16  ;;  %s372_s18 = int_to_ptr.vmem [resolvable:$true] %s29_s18 }
   0x5   :  { %s242_s21 = scalar_lea.hbm %s436_s0, 128 }
   0x6   :  { %p243_p0 = scmp.ne.s32.totalorder %s436_s0, %s242_s21  ;;  %p246_p1 = scmp.lt.u32.totalorder %s242_s21, %s436_s0 }
   0x8   :  { %p248_p2 = pnand %p246_p1, %p243_p0 }
   0xa   :  { %251 = shalt.err (!%p248_p2)
}
   0xb   :  { %s252_s26 = scalar_lea.vmem %s21_s16, 128  ;;  %p257_p4 = scmp.lt.s32.totalorder %s21_s16, %s21_s16 }
   0xc   :  { %p253_p3 = scmp.ne.s32.totalorder %s21_s16, %s252_s26  ;;  %p258_p5 = scmp.lt.s32.totalorder %s252_s26, %s252_s26 }
   0xe   :  { %p259_p6 = por %p258_p5, %p257_p4 }
  0x10   :  { %p260_p7 = pnand %p259_p6, %p253_p3 }
  0x12   :  { %263 = shalt.err (!%p260_p7)
}
  0x13   :  { %23 = dma.hbm_to_vmem [thread:$0]  %s436_s0, 128, %s21_s16, [#allocation3]  }
  0x14   :  { %s264_s5 = scalar_lea.hbm %s437_s1, 512 }
  0x15   :  { %p265_p8 = scmp.ne.s32.totalorder %s437_s1, %s264_s5  ;;  %p268_p9 = scmp.lt.u32.totalorder %s264_s5, %s437_s1 }
  0x17   :  { %p270_p10 = pnand %p268_p9, %p265_p8 }
  0x19   :  { %273 = shalt.err (!%p270_p10)
}
  0x1a   :  { %s274_s10 = scalar_lea.vmem %s372_s18, 512  ;;  %p279_p12 = scmp.lt.s32.totalorder %s372_s18, %s372_s18 }
  0x1b   :  { %p275_p11 = scmp.ne.s32.totalorder %s372_s18, %s274_s10  ;;  %p280_p13 = scmp.lt.s32.totalorder %s274_s10, %s274_s10 }
  0x1d   :  { %p281_p0 = por %p280_p13, %p279_p12 }
  0x1f   :  { %p282_p1 = pnand %p281_p0, %p275_p11 }
  0x21   :  { %285 = shalt.err (!%p282_p1)
}
  0x22   :  { %s340_s0 = smov 128   ;;  %s341_s11 = smov 8  }
  0x23   :  { %35 = dma.hbm_to_vmem [thread:$0]  %s437_s1, 512, %s372_s18, [#allocation6], %s340_s0, %s340_s0, %s341_s11  }
  0x24   :  { %330 = dma.done.wait [#allocation3], 128  }
  0x25   :  { %331 = vsyncadd [#allocation3], 4294967168 }
  0x26   :  { %332 = dma.done.wait [#allocation6], 512  }
  0x27   :  { %333 = vsyncadd [#allocation6], 4294966784  ;;  %v342_v0 = vmov 0.0|0.0   ;;  %vm343_vm0 = vmmov 0   ;;  %v344_v1 = vmov 0.0   ;;  %vm57_vm1 = vcmask 261120  }
  0x28   :  { %225 = vmatprep.subr.bf16.mxu0 %v342_v0  ;;  %222 = vmatprep.mubr.msk.f32.mxu0 %vm343_vm0, %v344_v1  ;;  %v46_v2 = vld [vmem:[#allocation5] sm:$0xff]  ;;  %v47_v3 = vld [vmem:[#allocation5 + $0x8] sm:$0xff]  ;;  %vm227_vm2 = vmpackc.low %vm57_vm1, %vm57_vm1  ;;  %s345_s15 = smov [#allocation7]  }
  0x29   :  { %v226_v4 = vpack.c.bf16 %v47_v3, %v46_v2  ;;  %v48_v5 = vld [vmem:[#allocation5 + $0x10] sm:$0xff]  ;;  %v49_v6 = vld [vmem:[#allocation5 + $0x18] sm:$0xff]  ;;  %s179_s16 = sshll.u32 %s345_s15, 4  ;;  %s180_s16 = int_to_ptr.vmem [resolvable:$true] %s179_s16 }
  0x2a   :  { %v230_v7 = vpack.c.bf16 %v49_v6, %v48_v5  ;;  %v45_v8 = vld [vmem:[#allocation2] sm:$0xff]  ;;  %s286_s17 = scalar_lea.vmem %s180_s16, 128  ;;  %p291_p3 = scmp.lt.s32.totalorder %s180_s16, %s180_s16 }
  0x2b   :  { %228 = vmatpush3.bf16.xpose.msk.msra.mxu0 %vm227_vm2, %v226_v4  ;;  %v203_v9 = vld [vmem:[%s438_s2] ss:$0 sm:$0xff]  ;;  %p287_p2 = scmp.ne.s32.totalorder %s180_s16, %s286_s17  ;;  %p292_p4 = scmp.lt.s32.totalorder %s286_s17, %s286_s17 }
  0x2c   :  { %229 = vmatprep.subr.bf16.mxu0 %v342_v0 }
  0x2d   :  { %p293_p5 = por %p292_p4, %p291_p3 }
  0x2f   :  { %p294_p6 = pnand %p293_p5, %p287_p2 }
  0x33   :  { %232 = vmatpush3.bf16.xpose.msk.msra.mxu0 %vm227_vm2, %v230_v7 }
  0x3a   :  { %223 = vmatmul.mubr.msk.f32.vlgmr.msra.gmra.mrb[0].mxu0 %vm57_vm1, %v45_v8 }
 0x10d   :  { %v139_v10 = vpop.f32.mrb[0].mxu0 }
 0x10e   :  { %v140_v11 = vadd.f32 %v203_v9, %v139_v10  ;;  %v224_v12 = vpop.f32.mrb[1].mxu0 }
 0x110   :  { %vm143_vm3 = vcmp.ge.f32.partialorder %v140_v11, 0.0  ;;  %v144_v13 = vmul.f32 0.01, %v140_v11 }
 0x112   :  { %v145_v14 = vsel %vm143_vm3, %v140_v11, %v144_v13 }
 0x113   :  { %v146_v15 = vadd.f32 %v145_v14, %v45_v8 }
 0x115   :  { %v154_v16 = vsel %vm57_vm1, %v146_v15, 0.0  ;;  %v161_v17 = vmul.f32 %v146_v15, %v146_v15  ;;  %147 = vst.msk [vmem:[#allocation7] sm:$0xff] %vm57_vm1, %v146_v15 }
 0x116   :  { %v155_v18 = vrot.slane %v154_v16, 4 }
 0x117   :  { %297 = shalt.err (!%p294_p6)
}
 0x118   :  { %s298_s19 = scalar_lea.hbm %s439_s3, 128 }
 0x119   :  { %p299_p7 = scmp.ne.s32.totalorder %s439_s3, %s298_s19  ;;  %p302_p8 = scmp.lt.u32.totalorder %s298_s19, %s439_s3 }
 0x11b   :  { %p304_p9 = pnand %p302_p8, %p299_p7 }
 0x11d   :  { %307 = shalt.err (!%p304_p9)
}
 0x11e   :  { %182 = dma.vmem_to_hbm [thread:$0]  %s180_s16, 128, %s439_s3, [#allocation4]   ;;  %v162_v19 = vsel %vm57_vm1, %v161_v17, 0.0  ;;  %v156_v20 = vadd.f32 %v155_v18, %v154_v16  ;;  %vm169_vm4 = vcmask 1040384   ;;  %vm171_vm5 = vcmask 254976  }
 0x11f   :  { %v163_v21 = vrot.slane %v162_v19, 4  ;;  %s346_s26 = smov [#allocation8]  }
 0x120   :  { %v157_v22 = vrot.slane %v156_v20, 2  ;;  %s189_s27 = sshll.u32 %s346_s26, 4  ;;  %s190_s27 = int_to_ptr.vmem [resolvable:$true] %s189_s27 }
 0x121   :  { %v164_v23 = vadd.f32 %v163_v21, %v162_v19  ;;  %s308_s3 = scalar_lea.vmem %s190_s27, 32  ;;  %p313_p11 = scmp.lt.s32.totalorder %s190_s27, %s190_s27 }
 0x122   :  { %v158_v24 = vadd.f32 %v157_v22, %v156_v20  ;;  %p309_p10 = scmp.ne.s32.totalorder %s190_s27, %s308_s3  ;;  %p314_p12 = scmp.lt.s32.totalorder %s308_s3, %s308_s3 }
 0x123   :  { %v165_v25 = vrot.slane %v164_v23, 2 }
 0x124   :  { %v159_v26 = vrot.slane %v158_v24, 1  ;;  %p315_p13 = por %p314_p12, %p313_p11 }
 0x125   :  { %v166_v27 = vadd.f32 %v165_v25, %v164_v23 }
 0x126   :  { %v160_v29 = vadd.f32 %v159_v26, %v158_v24  ;;  %p316_p0 = pnand %p315_p13, %p309_p10 }
 0x127   :  { %v167_v28 = vrot.slane %v166_v27, 1 }
 0x129   :  { %v168_v30 = vadd.f32 %v167_v28, %v166_v27 }
 0x12b   :  { %v170_v31 = vsel %vm169_vm4, %v160_v29, %v168_v30 }
 0x12c   :  { %172 = vst.msk [vmem:[#allocation8] sm:$0x3] %vm171_vm5, %v170_v31 }
 0x12d   :  { %319 = shalt.err (!%p316_p0)
}
 0x12e   :  { %s320_s30 = scalar_lea.hbm %s440_s4, 32 }
 0x12f   :  { %p321_p1 = scmp.ne.s32.totalorder %s440_s4, %s320_s30  ;;  %p324_p2 = scmp.lt.u32.totalorder %s320_s30, %s440_s4 }
 0x131   :  { %p326_p3 = pnand %p324_p2, %p321_p1 }
 0x133   :  { %329 = shalt.err (!%p326_p3)
}
 0x134   :  { %192 = dma.vmem_to_hbm [thread:$0]  %s190_s27, 32, %s440_s4, [#allocation9]  }
 0x135   :  { %334 = dma.done.wait [#allocation4], 128  }
 0x136   :  { %335 = vsyncadd [#allocation4], 4294967168 }
 0x137   :  { %336 = dma.done.wait [#allocation9], 32  }
 0x138   :  { %337 = vsyncadd [#allocation9], 4294967264 }
 0x139   :  { %199 = vsyncpa [#allocation3], 1 }
 0x13a   :  { %200 = vsyncpa [#allocation6], 1 }
 0x13b   :  { %201 = vsyncpa [#allocation4], 1 }
 0x13c   :  { %202 = vsyncpa [#allocation9], 1 }

</bundles_post_ra>
